<compile_context>
chip_gen: v7x
topology: tpu7x:2x2x1
jax: 0.10.0
libtpu: 0.0.40
codegen_flags: <defaults>
</compile_context>

<pallas_src>
import functools

import jax
import jax.numpy as jnp
from jax.experimental import pallas as pl
from jax.experimental.pallas import tpu as pltpu


def _round_up(n, m):
    return ((n + m - 1) // m) * m


# ----------------------------------------------------------------------------
# Kernel: fused Projector forward over a packed weight slab.
# ----------------------------------------------------------------------------
def _projector_kernel(meta, xcat_ref, slab_ref, out_ref):
    """meta: static tuple of (w_row, k_in, k_out, b_row, relu) per layer.

    xcat_ref : (B, S*E + E) f32   -- [x.reshape(B, S*E) | stats]
    slab_ref : (rows, lanes) f32  -- packed [W_fused, b1, W2, b2, ..., W_out]
    out_ref  : (B, O) f32
    """
    h = xcat_ref[...]
    for (w_row, k_in, k_out, b_row, relu) in meta:
        w = slab_ref[w_row:w_row + k_in, 0:k_out]          # static slice (view)
        h = jnp.dot(h, w, preferred_element_type=jnp.float32)
        if b_row >= 0:
            h = h + slab_ref[b_row:b_row + 1, 0:k_out]      # (1, k_out) broadcast
        if relu:
            h = jnp.maximum(h, 0.0)
    out_ref[...] = h.astype(out_ref.dtype)


# ----------------------------------------------------------------------------
# One-time weight preprocessing (NOT on the per-call path).
# ----------------------------------------------------------------------------
def _build_circulant_conv_matrix(conv_w, enc_in):
    """conv_w: (1, S, K) Conv1d weight.  Returns Wcirc (S*E, E) such that
    (x.reshape(B, S*E) @ Wcirc)[b, p] == circular_conv1d(x)[b, 0, p]."""
    _, S, K = conv_w.shape
    L = enc_in
    pad = (K - 1) // 2                                       # = 1 for kernel_size 3
    p = jnp.arange(L)
    k = jnp.arange(K)
    q = (p[None, :] - pad + k[:, None]) % L                  # (K, L): source index
    onehot = (q[:, :, None] == jnp.arange(L)[None, None, :]).astype(conv_w.dtype)
    wcirc = jnp.einsum('ck,kpq->cqp', conv_w[0], onehot,
                       precision=jax.lax.Precision.HIGHEST)  # (S, Lq, Lp)
    return wcirc.reshape(S * L, L)


def prepare_projector(params, enc_in, seq_len):
    """Fold conv + first Linear, pack everything into one slab.  Run ONCE."""
    hi = jax.lax.Precision.HIGHEST
    f32 = jnp.float32
    E, S = enc_in, seq_len

    conv_w = jnp.asarray(params["conv_w"], f32)              # (1, S, K)
    layers = [(jnp.asarray(W, f32), jnp.asarray(b, f32))
              for (W, b) in params["layers"]]
    w_out = jnp.asarray(params["w_out"], f32)                # (O, H_last)

    wcirc = _build_circulant_conv_matrix(conv_w, E)          # (S*E, E)
    W1, b1 = layers[0]                                       # (H1, 2E), (H1,)
    w1a = W1[:, :E].T                                        # acts on conv output
    w1b = W1[:, E:].T                                        # acts on stats
    # conv + concat + first Linear folded into ONE weight: (S*E + E, H1)
    w_fused = jnp.concatenate([jnp.dot(wcirc, w1a, precision=hi), w1b], axis=0)

    mats = [(w_fused, b1, True)]
    for (W, b) in layers[1:]:
        mats.append((W.T, b, True))
    mats.append((w_out.T, None, False))                      # final, no bias/relu

    lanes = max(128, _round_up(max(int(W.shape[1]) for (W, _, _) in mats), 128))
    blocks, meta, row = [], [], 0
    for (W, b, relu) in mats:
        k_in, k_out = int(W.shape[0]), int(W.shape[1])
        k_in_pad = _round_up(k_in, 8)                        # keep 8-row alignment
        blocks.append(jnp.zeros((k_in_pad, lanes), f32).at[:k_in, :k_out].set(W))
        w_row, row = row, row + k_in_pad
        if b is not None:
            blocks.append(jnp.zeros((8, lanes), f32).at[0, :k_out].set(b))
            b_row, row = row, row + 8
        else:
            b_row = -1
        meta.append((w_row, k_in, k_out, b_row, relu))
    slab = jnp.concatenate(blocks, axis=0)                   # (rows, lanes) f32
    return slab, tuple(meta), int(w_out.shape[0])


def make_projector_forward(meta, out_dim):
    kernel = functools.partial(_projector_kernel, meta)

    @jax.jit
    def forward(x, stats, slab):
        """x: (B, seq_len, enc_in), stats: (B, 1, enc_in) -> (B, out_dim)."""
        B, S, E = x.shape
        xcat = jnp.concatenate(
            [x.reshape(B, S * E), stats.reshape(B, E)], axis=1).astype(jnp.float32)
        return pl.pallas_call(
            kernel,
            out_shape=jax.ShapeDtypeStruct((B, out_dim), jnp.float32),
            in_specs=[pl.BlockSpec(memory_space=pltpu.MemorySpace.VMEM),
                      pl.BlockSpec(memory_space=pltpu.MemorySpace.VMEM)],
            out_specs=pl.BlockSpec(memory_space=pltpu.MemorySpace.VMEM),
        )(xcat, slab)

    return forward


# ----------------------------------------------------------------------------
# Pure-JAX reference (mirrors the PyTorch forward exactly)
# ----------------------------------------------------------------------------
def projector_reference(x, stats, params):
    B, S, E = x.shape
    w = params["conv_w"][0]                                  # (S, K)
    K = w.shape[-1]
    pad = (K - 1) // 2
    xp = jnp.concatenate([x[:, :, E - pad:], x, x[:, :, :pad]], axis=2)  # circular
    hi = jax.lax.Precision.HIGHEST
    conv = sum(jnp.einsum('bsl,s->bl', xp[:, :, k:k + E], w[:, k], precision=hi)
               for k in range(K))                            # (B, E)
    h = jnp.concatenate([conv[:, None, :], stats], axis=1).reshape(B, -1)  # (B, 2E)
    for (W, b) in params["layers"]:
        h = jax.nn.relu(jnp.dot(h, W.T, precision=hi) + b)
    return jnp.dot(h, params["w_out"].T, precision=hi)


# ----------------------------------------------------------------------------
# Parameter init (PyTorch-shaped weights)
# ----------------------------------------------------------------------------
def init_projector_params(key, enc_in, seq_len, hidden_dims, hidden_layers,
                          output_dim, kernel_size=3):
    n_keys = 1 + 2 * hidden_layers + 1
    keys = jax.random.split(key, n_keys)
    cb = 1.0 / jnp.sqrt(jnp.float32(seq_len * kernel_size))
    conv_w = jax.random.uniform(keys[0], (1, seq_len, kernel_size),
                                jnp.float32, -cb, cb)
    layers = []
    in_dim = 2 * enc_in
    ki = 1
    for i in range(hidden_layers):
        out_d = hidden_dims[i]
        b = 1.0 / jnp.sqrt(jnp.float32(in_dim))
        W = jax.random.uniform(keys[ki], (out_d, in_dim), jnp.float32, -b, b)
        bias = jax.random.uniform(keys[ki + 1], (out_d,), jnp.float32, -b, b)
        layers.append((W, bias))
        in_dim = out_d
        ki += 2
    b = 1.0 / jnp.sqrt(jnp.float32(in_dim))
    w_out = jax.random.uniform(keys[ki], (output_dim, in_dim), jnp.float32, -b, b)
    return dict(conv_w=conv_w, layers=layers, w_out=w_out)


# ----------------------------------------------------------------------------
if __name__ == "__main__":
    # Projector(enc_in=16, seq_len=8, hidden_dims=[32,32], hidden_layers=2,
    #           output_dim=8, kernel_size=3); x: (2, 8, 16), stats: (2, 1, 16)
    B, ENC_IN, SEQ_LEN = 2, 16, 8
    HIDDEN_DIMS, HIDDEN_LAYERS, OUTPUT_DIM = [32, 32], 2, 8

    key = jax.random.PRNGKey(0)
    kx, ks, kp = jax.random.split(key, 3)
    x = jax.random.normal(kx, (B, SEQ_LEN, ENC_IN), jnp.float32)
    stats = jax.random.normal(ks, (B, 1, ENC_IN), jnp.float32)
    params = init_projector_params(kp, ENC_IN, SEQ_LEN, HIDDEN_DIMS,
                                   HIDDEN_LAYERS, OUTPUT_DIM)

    # One-time preprocessing (conv fold + slab packing), kept off the call path.
    slab, meta, out_dim = prepare_projector(params, ENC_IN, SEQ_LEN)
    projector_forward = make_projector_forward(meta, out_dim)

    out = jax.block_until_ready(projector_forward(x, stats, slab))
    ref = jax.block_until_ready(projector_reference(x, stats, params))

    assert out.shape == (B, OUTPUT_DIM)
    # Kernel matmuls accumulate in f32 on the MXU; reference uses Precision.HIGHEST.
    # Small tolerance margin covers the rounding-order change from the conv fold.
    err = float(jnp.max(jnp.abs(out - ref)))
    assert jnp.allclose(out, ref, atol=5e-4, rtol=5e-4), err
    print("KERNEL_OK")
</pallas_src>

<mosaic_0001>
module attributes {stable_mosaic.version = 11 : i64} {
  func.func @_projector_kernel(%arg0: memref<2x144xf32, #tpu.memory_space<vmem>>, %arg1: memref<224x128xf32, #tpu.memory_space<vmem>>, %arg2: memref<2x8xf32, #tpu.memory_space<vmem>>) attributes {dimension_semantics = [], scalar_prefetch = 0 : i64, scratch_operands = 0 : i64, tpu.core_type = #tpu.core_type<tc>} {
    %c0 = arith.constant 0 : index
    %c0_0 = arith.constant 0 : index
    %0 = vector.load %arg0[%c0, %c0_0] : memref<2x144xf32, #tpu.memory_space<vmem>>, vector<2x144xf32>
    %c0_1 = arith.constant 0 : index
    %c0_2 = arith.constant 0 : index
    %1 = vector.load %arg1[%c0_1, %c0_2] : memref<224x128xf32, #tpu.memory_space<vmem>>, vector<144x32xf32>
    %cst = arith.constant dense<0.000000e+00> : vector<2x32xf32>
    %2 = tpu.matmul %0, %1, %cst {dimension_numbers = #tpu.dot_dimension_numbers<[1], [0], [0], [1], [0, 0, 1, 1], [], []>} : vector<2x144xf32>, vector<144x32xf32>, vector<2x32xf32> -> vector<2x32xf32>
    %c144 = arith.constant 144 : index
    %c0_3 = arith.constant 0 : index
    %3 = vector.load %arg1[%c144, %c0_3] : memref<224x128xf32, #tpu.memory_space<vmem>>, vector<1x32xf32>
    %4 = vector.broadcast %3 : vector<1x32xf32> to vector<2x32xf32>
    %5 = arith.addf %2, %4 : vector<2x32xf32>
    %cst_4 = arith.constant 0.000000e+00 : f32
    %6 = vector.broadcast %cst_4 : f32 to vector<2x32xf32>
    %7 = arith.maximumf %5, %6 : vector<2x32xf32>
    %c152 = arith.constant 152 : index
    %c0_5 = arith.constant 0 : index
    %8 = vector.load %arg1[%c152, %c0_5] : memref<224x128xf32, #tpu.memory_space<vmem>>, vector<32x32xf32>
    %cst_6 = arith.constant dense<0.000000e+00> : vector<2x32xf32>
    %9 = tpu.matmul %7, %8, %cst_6 {dimension_numbers = #tpu.dot_dimension_numbers<[1], [0], [0], [1], [0, 0, 1, 1], [], []>} : vector<2x32xf32>, vector<32x32xf32>, vector<2x32xf32> -> vector<2x32xf32>
    %c184 = arith.constant 184 : index
    %c0_7 = arith.constant 0 : index
    %10 = vector.load %arg1[%c184, %c0_7] : memref<224x128xf32, #tpu.memory_space<vmem>>, vector<1x32xf32>
    %11 = vector.broadcast %10 : vector<1x32xf32> to vector<2x32xf32>
    %12 = arith.addf %9, %11 : vector<2x32xf32>
    %cst_8 = arith.constant 0.000000e+00 : f32
    %13 = vector.broadcast %cst_8 : f32 to vector<2x32xf32>
    %14 = arith.maximumf %12, %13 : vector<2x32xf32>
    %c192 = arith.constant 192 : index
    %c0_9 = arith.constant 0 : index
    %15 = vector.load %arg1[%c192, %c0_9] : memref<224x128xf32, #tpu.memory_space<vmem>>, vector<32x8xf32>
    %cst_10 = arith.constant dense<0.000000e+00> : vector<2x8xf32>
    %16 = tpu.matmul %14, %15, %cst_10 {dimension_numbers = #tpu.dot_dimension_numbers<[1], [0], [0], [1], [0, 0, 1, 1], [], []>} : vector<2x32xf32>, vector<32x8xf32>, vector<2x8xf32> -> vector<2x8xf32>
    %c0_11 = arith.constant 0 : index
    %c0_12 = arith.constant 0 : index
    %17 = vector.load %arg2[%c0_11, %c0_12] : memref<2x8xf32, #tpu.memory_space<vmem>>, vector<2x8xf32>
    tpu.vector_store %arg2[%c0_11, %c0_12], %16 {strides = array<i32>} : memref<2x8xf32, #tpu.memory_space<vmem>>, vector<2x8xf32>,
    return
  }
}

</mosaic_0001>

<bundles_post_ra>
// kernel: forward.1
= control target key start
LH: loop header
LB: loop body
LE: loop exit
PB: predicated region body
PF: predicated region fallthrough
CT: control target
= control target key end

     0   :  { %7 = vsyncpa [#allocation3], 0  ;;  %s508_s0 = inlined_call_operand.vmem [shape: f32[2,144], index: 0, kind: input, shape index: {}]   ;;  %s509_s1 = inlined_call_operand.hbm [shape: f32[224,128], index: 1, kind: input, shape index: {}]   ;;  %s510_s2 = inlined_call_operand.hbm [shape: f32[2,8], index: 2, kind: output, shape index: {}]  }
   0x1   :  { %8 = vsyncpa [#allocation4], 0  ;;  %s444_s9 = smov [#allocation2]   ;;  %s396_s13 = scalar_lea.hbm %s509_s1, 3584 }
   0x2   :  { %s16_s10 = sshll.u32 %s444_s9, 4  ;;  %p397_p0 = scmp.ne.s32.totalorder %s509_s1, %s396_s13  ;;  %s17_s10 = int_to_ptr.vmem [resolvable:$true] %s16_s10 }
   0x3   :  { %p400_p1 = scmp.lt.u32.totalorder %s396_s13, %s509_s1 }
   0x5   :  { %p402_p2 = pnand %p400_p1, %p397_p0 }
   0x7   :  { %405 = shalt.err (!%p402_p2)
}
   0x8   :  { %s406_s18 = scalar_lea.vmem %s17_s10, 3584  ;;  %p411_p4 = scmp.lt.s32.totalorder %s17_s10, %s17_s10 }
   0x9   :  { %p407_p3 = scmp.ne.s32.totalorder %s17_s10, %s406_s18  ;;  %p412_p5 = scmp.lt.s32.totalorder %s406_s18, %s406_s18 }
   0xb   :  { %p413_p6 = por %p412_p5, %p411_p4 }
   0xd   :  { %p414_p7 = pnand %p413_p6, %p407_p3 }
   0xf   :  { %417 = shalt.err (!%p414_p7)
}
  0x10   :  { %s445_s19 = smov 128   ;;  %s446_s20 = smov 8  }
  0x11   :  { %22 = dma.hbm_to_vmem [thread:$0]  %s509_s1, 3584, %s17_s10, [#allocation3], %s445_s19, %s445_s19, %s446_s20  }
  0x12   :  { %440 = dma.done.wait [#allocation3], 3584  }
  0x13   :  { %441 = vsyncadd [#allocation3], 4294963712  ;;  %v447_v0 = vmov 0.0|0.0   ;;  %v27_v1 = vld [vmem:[#allocation2] sm:$0xff]  ;;  %v28_v2 = vld [vmem:[#allocation2 + $0x8] sm:$0xff]  ;;  %vm60_vm0 = vcmask 130048  }
  0x14   :  { %350 = vmatprep.subr.bf16.mxu0 %v447_v0  ;;  %377 = vmatprep.subr.bf16.mxu1 %v447_v0  ;;  %v29_v3 = vld [vmem:[#allocation2 + $0x10] sm:$0xff]  ;;  %v351_v4 = vpack.c.bf16 %v28_v2, %v27_v1  ;;  %v30_v5 = vld [vmem:[#allocation2 + $0x18] sm:$0xff]  ;;  %v31_v7 = vld [vmem:[#allocation2 + $0x20] sm:$0xff]  ;;  %vm448_vm1 = vmmov 0   ;;  %v449_v36 = vmov 0.0   ;;  %vm143_vm2 = vcmask 261120  }
  0x15   :  { %v354_v6 = vpack.c.bf16 %v30_v5, %v29_v3  ;;  %v32_v8 = vld [vmem:[#allocation2 + $0x28] sm:$0xff]  ;;  %v313_v9 = vld.sshfl [vmem:[%s508_s0] sm:$0x33 pattern:$0x76325410]  ;;  %v134_v10 = vld [vmem:[#allocation2 + $0x98] sm:$0xff]  ;;  %336 = vmatprep.mubr.msk.f32.mxu1 %vm448_vm1, %v449_v36 }
  0x16   :  { %352 = vmatpush1.bf16.msra.mxu0 %v351_v4  ;;  %v135_v11 = vld [vmem:[#allocation2 + $0xa0] sm:$0xff]  ;;  %v357_v12 = vpack.c.bf16 %v32_v8, %v31_v7  ;;  %v58_v13 = vcombine.high %v313_v9, %v313_v9  ;;  %v33_v15 = vld [vmem:[#allocation2 + $0x30] sm:$0xff]  ;;  %v34_v16 = vld [vmem:[#allocation2 + $0x38] sm:$0xff]  ;;  %s450_s0 = smov [#allocation5]   ;;  %vm295_vm3 = vcmask 58368  }
  0x17   :  { %353 = vmatprep.subr.bf16.mxu0 %v447_v0  ;;  %v378_v14 = vpack.c.bf16 %v135_v11, %v134_v10  ;;  %v360_v17 = vpack.c.bf16 %v34_v16, %v33_v15  ;;  %v35_v18 = vld [vmem:[#allocation2 + $0x40] sm:$0xff]  ;;  %v36_v19 = vld [vmem:[#allocation2 + $0x48] sm:$0xff]  ;;  %v37_v21 = vld [vmem:[#allocation2 + $0x50] sm:$0xff]  ;;  %s303_s24 = sshll.u32 %s450_s0, 4  ;;  %s304_s24 = int_to_ptr.vmem [resolvable:$true] %s303_s24 }
  0x18   :  { %314 = vmatprep.mubr.msk.f32.mxu0 %vm60_vm0, %v58_v13  ;;  %v363_v20 = vpack.c.bf16 %v36_v19, %v35_v18  ;;  %v38_v22 = vld [vmem:[#allocation2 + $0x58] sm:$0xff]  ;;  %v39_v24 = vld [vmem:[#allocation2 + $0x60] sm:$0xff]  ;;  %v40_v25 = vld [vmem:[#allocation2 + $0x68] sm:$0xff]  ;;  %s418_s25 = scalar_lea.vmem %s304_s24, 32  ;;  %p423_p9 = scmp.lt.s32.totalorder %s304_s24, %s304_s24 }
  0x19   :  { %379 = vmatpush3.bf16.msra.mxu1 %v378_v14  ;;  %v366_v23 = vpack.c.bf16 %v38_v22, %v37_v21  ;;  %v369_v26 = vpack.c.bf16 %v40_v25, %v39_v24  ;;  %v41_v27 = vld [vmem:[#allocation2 + $0x70] sm:$0xff]  ;;  %v42_v28 = vld [vmem:[#allocation2 + $0x78] sm:$0xff]  ;;  %v43_v30 = vld [vmem:[#allocation2 + $0x80] sm:$0xff]  ;;  %p419_p8 = scmp.ne.s32.totalorder %s304_s24, %s418_s25  ;;  %p424_p10 = scmp.lt.s32.totalorder %s418_s25, %s418_s25 }
  0x1a   :  { %355 = vmatpush1.bf16.msra.mxu0 %v354_v6  ;;  %380 = vmatprep.subr.bf16.mxu1 %v447_v0  ;;  %v372_v29 = vpack.c.bf16 %v42_v28, %v41_v27  ;;  %v44_v31 = vld [vmem:[#allocation2 + $0x88] sm:$0xff]  ;;  %v137_v34 = vld [vmem:[#allocation2 + $0xb0] sm:$0xff]  ;;  %v218_v38 = vld [vmem:[#allocation2 + $0xc0] sm:$0xff] }
  0x1b   :  { %356 = vmatprep.subr.bf16.mxu0 %v447_v0  ;;  %v375_v32 = vpack.c.bf16 %v44_v31, %v43_v30  ;;  %v136_v33 = vld [vmem:[#allocation2 + $0xa8] sm:$0xff]  ;;  %v312_v37 = vld [vmem:[#allocation2 + $0x90] ss:$0 sm:$0xff]  ;;  %v221_v46 = vld [vmem:[#allocation2 + $0xd8] sm:$0xff]  ;;  %p425_p11 = por %p424_p10, %p423_p9 }
  0x1c   :  { %v381_v35 = vpack.c.bf16 %v137_v34, %v136_v33  ;;  %v219_v39 = vld [vmem:[#allocation2 + $0xc8] sm:$0xff]  ;;  %v220_v45 = vld [vmem:[#allocation2 + $0xd0] sm:$0xff]  ;;  %v315_v48 = vld [vmem:[#allocation2 + $0xb8] ss:$0 sm:$0xff] }
  0x1d   :  { %v384_v43 = vpack.c.bf16 %v219_v39, %v218_v38  ;;  %v387_v47 = vpack.c.bf16 %v221_v46, %v220_v45  ;;  %p426_p12 = pnand %p425_p11, %p419_p8 }
  0x1e   :  { %358 = vmatpush1.bf16.msra.mxu0 %v357_v12  ;;  %382 = vmatpush3.bf16.msra.mxu1 %v381_v35 }
  0x1f   :  { %359 = vmatprep.subr.bf16.mxu0 %v447_v0  ;;  %383 = vmatprep.subr.bf16.mxu1 %v447_v0 }
  0x22   :  { %361 = vmatpush1.bf16.msra.mxu0 %v360_v17 }
  0x23   :  { %362 = vmatprep.subr.bf16.mxu0 %v447_v0 }
  0x26   :  { %364 = vmatpush1.bf16.msra.mxu0 %v363_v20 }
  0x27   :  { %365 = vmatprep.subr.bf16.mxu0 %v447_v0 }
  0x2a   :  { %367 = vmatpush1.bf16.msra.mxu0 %v366_v23 }
  0x2b   :  { %368 = vmatprep.subr.bf16.mxu0 %v447_v0 }
  0x2e   :  { %370 = vmatpush1.bf16.msra.mxu0 %v369_v26 }
  0x2f   :  { %371 = vmatprep.subr.bf16.mxu0 %v447_v0 }
  0x32   :  { %373 = vmatpush1.bf16.msra.mxu0 %v372_v29 }
  0x33   :  { %374 = vmatprep.subr.bf16.mxu0 %v447_v0 }
  0x36   :  { %376 = vmatpush1.bf16.msra.mxu0 %v375_v32 }
  0x39   :  { %128 = vmatmul.mubr.f32.vlgmr.msra.gmra.mrb[0].mxu0 %v313_v9 }
 0x10c   :  { %v129_v40 = vpop.f32.mrb[0].mxu0 }
 0x10d   :  { %v130_v41 = vadd.f32 %v312_v37, %v129_v40  ;;  %v131_v42 = vpop.f32.mrb[1].mxu0 }
 0x10f   :  { %v133_v44 = vmax.f32 %v130_v41, 0.0 }
 0x111   :  { %337 = vmatmul.mubr.msk.f32.vlgmr.msra.gmra.mrb[0].mxu1 %vm143_vm2, %v133_v44 }
 0x112   :  { %385 = vmatpush3.bf16.msra.mxu1 %v384_v43  ;;  %347 = vmatprep.mubr.msk.f32.mxu1 %vm448_vm1, %v449_v36 }
 0x113   :  { %386 = vmatprep.subr.bf16.mxu1 %v447_v0 }
 0x116   :  { %388 = vmatpush3.bf16.msra.mxu1 %v387_v47 }
 0x1e4   :  { %v213_v49 = vpop.f32.mrb[0].mxu1 }
 0x1e5   :  { %v214_v50 = vadd.f32 %v315_v48, %v213_v49  ;;  %v338_v51 = vpop.f32.mrb[1].mxu1 }
 0x1e7   :  { %v217_v52 = vmax.f32 %v214_v50, 0.0 }
 0x1e9   :  { %348 = vmatmul.mubr.msk.f32.vlgmr.msra.gmra.mrb[2].mxu1 %vm143_vm2, %v217_v52 }
 0x2bc   :  { %v291_v53 = vpop.f32.mrb[2].mxu1 }
 0x2bd   :  { %v349_v54 = vpop.f32.mrb[3].mxu1  ;;  %296 = vst.msk [vmem:[#allocation5] sm:$0x3] %vm295_vm3, %v291_v53 }
 0x2be   :  { %429 = shalt.err (!%p426_p12)
}
 0x2bf   :  { %s430_s28 = scalar_lea.hbm %s510_s2, 32 }
 0x2c0   :  { %p431_p13 = scmp.ne.s32.totalorder %s510_s2, %s430_s28  ;;  %p434_p0 = scmp.lt.u32.totalorder %s430_s28, %s510_s2 }
 0x2c2   :  { %p436_p1 = pnand %p434_p0, %p431_p13 }
 0x2c4   :  { %439 = shalt.err (!%p436_p1)
}
 0x2c5   :  { %306 = dma.vmem_to_hbm [thread:$0]  %s304_s24, 32, %s510_s2, [#allocation4]  }
 0x2c6   :  { %442 = dma.done.wait [#allocation4], 32  }
 0x2c7   :  { %443 = vsyncadd [#allocation4], 4294967264 }
 0x2c8   :  { %310 = vsyncpa [#allocation3], 1 }
 0x2c9   :  { %311 = vsyncpa [#allocation4], 1 }

</bundles_post_ra>
